<compile_context>
chip_gen: v7x
topology: tpu7x:2x2x1
jax: 0.10.0
libtpu: 0.0.40
codegen_flags: <defaults>
</compile_context>

<pallas_src>
import jax
import jax.numpy as jnp
from jax.experimental import pallas as pl
from jax.experimental.pallas import tpu as pltpu


def _round_up(n, m):
    return ((n + m - 1) // m) * m


def _make_dqn_kernel(emit_q: bool):
    """Build the fused 3-layer MLP + greedy-argmax kernel.

    Refs (per batch tile of TB rows):
      x_ref   : [TB, D_in]
      w1_ref  : [D_in, H1]   b1_ref : [1, H1]   (biases always f32)
      w2_ref  : [H1, H2]     b2_ref : [1, H2]
      w3t_ref : [D_out, H2]  b3_ref : [D_out, 1]
      q_ref   : [D_out, TB]  (only if emit_q)  -- lane-dense transposed Q
      act_ref : [1, TB]      greedy action, int32, batch on the lane axis
    """

    def kernel(x_ref, w1_ref, b1_ref, w2_ref, b2_ref, w3t_ref, b3_ref,
               *out_refs):
        if emit_q:
            q_ref, act_ref = out_refs
        else:
            (act_ref,) = out_refs

        # MXU operand dtype follows the weights (bf16 by default, f32 optional);
        # accumulation and all elementwise math stay f32.
        cdt = w1_ref.dtype
        x = x_ref[...].astype(cdt)

        # Layer 1: Linear + ReLU
        h1 = jnp.dot(x, w1_ref[...], preferred_element_type=jnp.float32)
        h1 = jnp.maximum(h1 + b1_ref[...], 0.0).astype(cdt)

        # Layer 2: Linear + ReLU
        h2 = jnp.dot(h1, w2_ref[...], preferred_element_type=jnp.float32)
        h2 = jnp.maximum(h2 + b2_ref[...], 0.0).astype(cdt)

        # Layer 3 (output head), computed directly transposed:
        #   qT[o, t] = sum_k w3t[o, k] * h2[t, k]
        # (contract last dims of both operands -- native MXU pattern), so the
        # result is already lane-dense [D_out, TB].
        qT = jax.lax.dot_general(
            w3t_ref[...], h2,
            dimension_numbers=(((1,), (1,)), ((), ())),
            preferred_element_type=jnp.float32)
        qT = qT + b3_ref[...]

        if emit_q:
            q_ref[...] = qT.astype(q_ref.dtype)

        # Fused greedy action: max + first-max-index over the D_out sublane
        # axis (XLU slot, free alongside MXU/VPU work), result lane-dense.
        d_out = qT.shape[0]
        q_max = jnp.max(qT, axis=0, keepdims=True)                     # [1, TB]
        row = jax.lax.broadcasted_iota(jnp.int32, qT.shape, dimension=0)
        first_max = jnp.min(jnp.where(qT == q_max, row, d_out),
                            axis=0, keepdims=True)                     # [1, TB]
        # Defensive clamp: an all-NaN row would otherwise yield d_out.
        act_ref[...] = jnp.minimum(first_max, d_out - 1).astype(jnp.int32)

    return kernel


def _select_tile(B, batch_tile):
    """Pick the batch tile (tb) and number of grid steps."""
    if B <= 128:
        # Small-batch / act() path: one block equal to the full arrays, no pad
        # rows beyond layout padding.
        return B, 1
    # Clamp so there are >= 2 grid steps (two v7x TensorCores get work), while
    # keeping the tile a multiple of 128 so the lane-dense outputs stay
    # unmasked on interior blocks.
    tb = min(batch_tile, _round_up(pl.cdiv(B, 2), 128))
    tb = max(128, _round_up(tb, 128))
    return tb, pl.cdiv(B, tb)


def _dqn_call(x, p, *, batch_tile, emit_q, q_dtype):
    B, d_in = x.shape
    w1, b1 = p["w1"], p["b1"]
    w2, b2 = p["w2"], p["b2"]
    w3t, b3 = p["w3t"], p["b3"]
    h1d, h2d = w1.shape[1], w2.shape[1]
    d_out = w3t.shape[0]

    tb, n_blocks = _select_tile(B, batch_tile)

    out_shapes = []
    out_specs = []
    if emit_q:
        out_shapes.append(jax.ShapeDtypeStruct((d_out, B), q_dtype))
        out_specs.append(pl.BlockSpec((d_out, tb), lambda i: (0, i)))
    out_shapes.append(jax.ShapeDtypeStruct((1, B), jnp.int32))
    out_specs.append(pl.BlockSpec((1, tb), lambda i: (0, i)))

    outs = pl.pallas_call(
        _make_dqn_kernel(emit_q),
        out_shape=tuple(out_shapes),
        grid_spec=pltpu.PrefetchScalarGridSpec(
            num_scalar_prefetch=0,
            grid=(n_blocks,),
            in_specs=[
                pl.BlockSpec((tb, d_in), lambda i: (i, 0)),     # x tile
                pl.BlockSpec((d_in, h1d), lambda i: (0, 0)),    # w1 (resident)
                pl.BlockSpec((1, h1d), lambda i: (0, 0)),       # b1
                pl.BlockSpec((h1d, h2d), lambda i: (0, 0)),     # w2
                pl.BlockSpec((1, h2d), lambda i: (0, 0)),       # b2
                pl.BlockSpec((d_out, h2d), lambda i: (0, 0)),   # w3 transposed
                pl.BlockSpec((d_out, 1), lambda i: (0, 0)),     # b3
            ],
            out_specs=out_specs,
        ),
        compiler_params=pltpu.CompilerParams(
            dimension_semantics=("parallel",),  # batch axis shards across TCs
        ),
    )(x, w1, b1, w2, b2, w3t, b3)

    if emit_q:
        q_t, act = outs
        return q_t, act[0]
    (act,) = outs
    return None, act[0]


def dqn_forward(x, params, *, batch_tile=256, q_dtype=jnp.float32):
    """Fused DQN forward: returns (Q-values [B, d_out], greedy actions [B]).

    `params` must come from `prepare_params` (kernel layout, weight dtype
    chosen once). Q-values are computed lane-dense ([d_out, B]) in the kernel;
    the tiny transpose back to the module's [B, d_out] convention happens
    outside (dense, unmasked). Set q_dtype=jnp.bfloat16 to halve Q writeback
    if downstream accepts bf16 (argmax is still taken on the f32 values).
    """
    q_t, act = _dqn_call(x, params, batch_tile=batch_tile,
                         emit_q=True, q_dtype=q_dtype)
    return q_t.T, act


def dqn_act(x, params, *, batch_tile=256):
    """Greedy-action-only fast path (DQN.act with epsilon=0): no Q writeback."""
    _, act = _dqn_call(x, params, batch_tile=batch_tile,
                       emit_q=False, q_dtype=jnp.float32)
    return act


def prepare_params(params, *, compute_dtype=jnp.bfloat16):
    """One-time (hoisted out of the per-call path) conversion to kernel layout.

    Input: canonical params w{1,2,3}: [in, out] f32, b{1,2,3}: [out] f32.
    Output: w1/w2 in compute_dtype, w3 stored transposed as w3t [d_out, H2] in
    compute_dtype (so the last matmul emits lane-dense [d_out, TB] directly),
    biases kept f32 with broadcast-ready shapes.
    """
    return {
        "w1": params["w1"].astype(compute_dtype),
        "b1": params["b1"].reshape(1, -1).astype(jnp.float32),
        "w2": params["w2"].astype(compute_dtype),
        "b2": params["b2"].reshape(1, -1).astype(jnp.float32),
        "w3t": params["w3"].T.astype(compute_dtype),
        "b3": params["b3"].reshape(-1, 1).astype(jnp.float32),
    }


def init_dqn_params(key, input_dim, output_dim, hidden_dims=(128, 128)):
    """Deterministic synthetic init (PyTorch-like uniform fan-in scaling).

    Weights stored as [in, out] (transposed vs. nn.Linear's [out, in]).
    """
    dims = [input_dim, *hidden_dims, output_dim]
    params = {}
    for idx in range(len(dims) - 1):
        fan_in, fan_out = dims[idx], dims[idx + 1]
        key, wk, bk = jax.random.split(key, 3)
        bound = 1.0 / (fan_in ** 0.5)
        params[f"w{idx + 1}"] = jax.random.uniform(
            wk, (fan_in, fan_out), jnp.float32, -bound, bound)
        params[f"b{idx + 1}"] = jax.random.uniform(
            bk, (fan_out,), jnp.float32, -bound, bound)
    return params


def dqn_reference(x, params):
    """Pure-JAX f32 reference for correctness check."""
    h = jnp.maximum(x @ params["w1"] + params["b1"], 0.0)
    h = jnp.maximum(h @ params["w2"] + params["b2"], 0.0)
    return h @ params["w3"] + params["b3"]


if __name__ == "__main__":
    # Shapes consistent with the module: input_dim=32, hidden=[128, 128],
    # output_dim=8 actions. B=300 is a replay-buffer-style batch that is NOT a
    # multiple of the tile (exercises the masked ragged last block -- with no
    # wrapper-side padding) and gives a 2-step "parallel" grid.
    B, INPUT_DIM, OUTPUT_DIM = 300, 32, 8

    key = jax.random.PRNGKey(0)
    pkey, xkey = jax.random.split(key)
    params = init_dqn_params(pkey, INPUT_DIM, OUTPUT_DIM, hidden_dims=(128, 128))
    x = jax.random.normal(xkey, (B, INPUT_DIM), dtype=jnp.float32)

    q_ref = dqn_reference(x, params)

    # f32 MXU-operand path: tight tolerance vs. the f32 reference.
    p32 = prepare_params(params, compute_dtype=jnp.float32)
    q32, a32 = dqn_forward(x, p32)
    q32 = jax.block_until_ready(q32)
    assert q32.shape == (B, OUTPUT_DIM)
    assert a32.shape == (B,)
    assert jnp.allclose(q32, q_ref, atol=1e-4, rtol=1e-4), "f32 mismatch vs reference"
    assert jnp.array_equal(a32, jnp.argmax(q32, axis=-1)), "fused argmax mismatch (f32)"

    # bf16 MXU-operand fast path (default; weights cast once here, f32 accum).
    pbf = prepare_params(params)  # bf16 weights, prepared once, reused per call
    qbf, abf = dqn_forward(x, pbf)
    qbf = jax.block_until_ready(qbf)
    assert jnp.allclose(qbf, q_ref, atol=5e-2, rtol=5e-2), "bf16 mismatch vs reference"
    assert jnp.array_equal(abf, jnp.argmax(qbf, axis=-1)), "fused argmax mismatch (bf16)"

    # Act-only fast path (DQN.act, eps=0): no Q output declared at all. Also
    # exercise the small-batch single-block path.
    a_full = jax.block_until_ready(dqn_act(x, pbf))
    assert a_full.shape == (B,)
    assert jnp.array_equal(a_full, abf), "act-only path disagrees with full path"
    a_small = jax.block_until_ready(dqn_act(x[:8], pbf))
    assert a_small.shape == (8,)
    assert jnp.array_equal(a_small, abf[:8]), "small-batch act path mismatch"

    # TODO(synk): epsilon-greedy exploration branch of DQN.act (host-side RNG +
    # Python control flow) intentionally stays outside the kernel.

    print("KERNEL_OK")
</pallas_src>

<mosaic_0001>
module attributes {stable_mosaic.version = 11 : i64} {
  func.func @kernel(%arg0: i32, %arg1: memref<256x32xf32, #tpu.memory_space<vmem>>, %arg2: memref<32x128xf32, #tpu.memory_space<vmem>>, %arg3: memref<1x128xf32, #tpu.memory_space<vmem>>, %arg4: memref<128x128xf32, #tpu.memory_space<vmem>>, %arg5: memref<1x128xf32, #tpu.memory_space<vmem>>, %arg6: memref<8x128xf32, #tpu.memory_space<vmem>>, %arg7: memref<8x1xf32, #tpu.memory_space<vmem>>, %arg8: memref<8x256xf32, #tpu.memory_space<vmem>>, %arg9: memref<1x256xi32, #tpu.memory_space<vmem>>) attributes {dimension_semantics = [#tpu.dimension_semantics<parallel>], iteration_bounds = array<i64: 2>, scalar_prefetch = 0 : i64, scratch_operands = 0 : i64, tpu.core_type = #tpu.core_type<tc>, window_params = [{transform_indices = @transform_0, window_bounds = array<i64: 256, 32>}, {pipeline_mode = #tpu.pipeline_mode<synchronous>, transform_indices = @transform_1, window_bounds = array<i64: 32, 128>}, {pipeline_mode = #tpu.pipeline_mode<synchronous>, transform_indices = @transform_2, window_bounds = array<i64: 1, 128>}, {pipeline_mode = #tpu.pipeline_mode<synchronous>, transform_indices = @transform_3, window_bounds = array<i64: 128, 128>}, {pipeline_mode = #tpu.pipeline_mode<synchronous>, transform_indices = @transform_4, window_bounds = array<i64: 1, 128>}, {pipeline_mode = #tpu.pipeline_mode<synchronous>, transform_indices = @transform_5, window_bounds = array<i64: 8, 128>}, {pipeline_mode = #tpu.pipeline_mode<synchronous>, transform_indices = @transform_6, window_bounds = array<i64: 8, 1>}, {transform_indices = @transform_7, window_bounds = array<i64: 8, 256>}, {transform_indices = @transform_8, window_bounds = array<i64: 1, 256>}]} {
    %c0 = arith.constant 0 : index
    %c0_0 = arith.constant 0 : index
    %0 = vector.load %arg1[%c0, %c0_0] : memref<256x32xf32, #tpu.memory_space<vmem>>, vector<256x32xf32>
    %c0_1 = arith.constant 0 : index
    %c0_2 = arith.constant 0 : index
    %1 = vector.load %arg2[%c0_1, %c0_2] : memref<32x128xf32, #tpu.memory_space<vmem>>, vector<32x128xf32>
    %cst = arith.constant dense<0.000000e+00> : vector<256x128xf32>
    %2 = tpu.matmul %0, %1, %cst {dimension_numbers = #tpu.dot_dimension_numbers<[1], [0], [0], [1], [0, 0, 1, 1], [], []>} : vector<256x32xf32>, vector<32x128xf32>, vector<256x128xf32> -> vector<256x128xf32>
    %c0_3 = arith.constant 0 : index
    %c0_4 = arith.constant 0 : index
    %3 = vector.load %arg3[%c0_3, %c0_4] : memref<1x128xf32, #tpu.memory_space<vmem>>, vector<1x128xf32>
    %4 = vector.broadcast %3 : vector<1x128xf32> to vector<256x128xf32>
    %5 = arith.addf %2, %4 : vector<256x128xf32>
    %cst_5 = arith.constant 0.000000e+00 : f32
    %6 = vector.broadcast %cst_5 : f32 to vector<256x128xf32>
    %7 = arith.maximumf %5, %6 : vector<256x128xf32>
    %c0_6 = arith.constant 0 : index
    %c0_7 = arith.constant 0 : index
    %8 = vector.load %arg4[%c0_6, %c0_7] : memref<128x128xf32, #tpu.memory_space<vmem>>, vector<128x128xf32>
    %cst_8 = arith.constant dense<0.000000e+00> : vector<256x128xf32>
    %9 = tpu.matmul %7, %8, %cst_8 {dimension_numbers = #tpu.dot_dimension_numbers<[1], [0], [0], [1], [0, 0, 1, 1], [], []>} : vector<256x128xf32>, vector<128x128xf32>, vector<256x128xf32> -> vector<256x128xf32>
    %c0_9 = arith.constant 0 : index
    %c0_10 = arith.constant 0 : index
    %10 = vector.load %arg5[%c0_9, %c0_10] : memref<1x128xf32, #tpu.memory_space<vmem>>, vector<1x128xf32>
    %11 = vector.broadcast %10 : vector<1x128xf32> to vector<256x128xf32>
    %12 = arith.addf %9, %11 : vector<256x128xf32>
    %cst_11 = arith.constant 0.000000e+00 : f32
    %13 = vector.broadcast %cst_11 : f32 to vector<256x128xf32>
    %14 = arith.maximumf %12, %13 : vector<256x128xf32>
    %c0_12 = arith.constant 0 : index
    %c0_13 = arith.constant 0 : index
    %15 = vector.load %arg6[%c0_12, %c0_13] : memref<8x128xf32, #tpu.memory_space<vmem>>, vector<8x128xf32>
    %cst_14 = arith.constant dense<0.000000e+00> : vector<8x256xf32>
    %16 = tpu.matmul %15, %14, %cst_14 {dimension_numbers = #tpu.dot_dimension_numbers<[1], [1], [0], [0], [0, 0, 1, 0], [], []>} : vector<8x128xf32>, vector<256x128xf32>, vector<8x256xf32> -> vector<8x256xf32>
    %c0_15 = arith.constant 0 : index
    %c0_16 = arith.constant 0 : index
    %17 = vector.load %arg7[%c0_15, %c0_16] : memref<8x1xf32, #tpu.memory_space<vmem>>, vector<8x1xf32>
    %18 = vector.broadcast %17 : vector<8x1xf32> to vector<8x256xf32>
    %19 = arith.addf %16, %18 : vector<8x256xf32>
    %c0_17 = arith.constant 0 : index
    %c0_18 = arith.constant 0 : index
    %20 = vector.load %arg8[%c0_17, %c0_18] : memref<8x256xf32, #tpu.memory_space<vmem>>, vector<8x256xf32>
    tpu.vector_store %arg8[%c0_17, %c0_18], %19 {strides = array<i32>} : memref<8x256xf32, #tpu.memory_space<vmem>>, vector<8x256xf32>,
    %cst_19 = arith.constant dense<0xFF800000> : vector<256xf32>
    %21 = vector.multi_reduction <maximumf>, %19, %cst_19 [0] : vector<8x256xf32> to vector<256xf32>
    %22 = vector.shape_cast %21 : vector<256xf32> to vector<1x256xf32>
    %23 = tpu.iota {dimensions = array<i32: 0>} : vector<8x256xi32>
    %24 = vector.broadcast %22 : vector<1x256xf32> to vector<8x256xf32>
    %25 = arith.cmpf oeq, %19, %24 : vector<8x256xf32>
    %c8_i32 = arith.constant 8 : i32
    %26 = vector.broadcast %c8_i32 : i32 to vector<8x256xi32>
    %27 = arith.select %25, %23, %26 : vector<8x256xi1>, vector<8x256xi32>
    %cst_20 = arith.constant dense<2147483647> : vector<256xi32>
    %28 = vector.multi_reduction <minsi>, %27, %cst_20 [0] : vector<8x256xi32> to vector<256xi32>
    %29 = vector.shape_cast %28 : vector<256xi32> to vector<1x256xi32>
    %c7_i32 = arith.constant 7 : i32
    %30 = vector.broadcast %c7_i32 : i32 to vector<1x256xi32>
    %31 = arith.minsi %29, %30 : vector<1x256xi32>
    %c0_21 = arith.constant 0 : index
    %c0_22 = arith.constant 0 : index
    %32 = vector.load %arg9[%c0_21, %c0_22] : memref<1x256xi32, #tpu.memory_space<vmem>>, vector<1x256xi32>
    tpu.vector_store %arg9[%c0_21, %c0_22], %31 {strides = array<i32>} : memref<1x256xi32, #tpu.memory_space<vmem>>, vector<1x256xi32>,
    return
  }
  func.func @transform_0(%arg0: i32) -> (i32, i32) {
    %c0_i32 = arith.constant 0 : i32
    %c0_i32_0 = arith.constant 0 : i32
    return %arg0, %c0_i32 : i32, i32
  }
  func.func @transform_1(%arg0: i32) -> (i32, i32) {
    %c0_i32 = arith.constant 0 : i32
    %c0_i32_0 = arith.constant 0 : i32
    %c0_i32_1 = arith.constant 0 : i32
    return %c0_i32, %c0_i32_0 : i32, i32
  }
  func.func @transform_2(%arg0: i32) -> (i32, i32) {
    %c0_i32 = arith.constant 0 : i32
    %c0_i32_0 = arith.constant 0 : i32
    %c0_i32_1 = arith.constant 0 : i32
    return %c0_i32, %c0_i32_0 : i32, i32
  }
  func.func @transform_3(%arg0: i32) -> (i32, i32) {
    %c0_i32 = arith.constant 0 : i32
    %c0_i32_0 = arith.constant 0 : i32
    %c0_i32_1 = arith.constant 0 : i32
    return %c0_i32, %c0_i32_0 : i32, i32
  }
  func.func @transform_4(%arg0: i32) -> (i32, i32) {
    %c0_i32 = arith.constant 0 : i32
    %c0_i32_0 = arith.constant 0 : i32
    %c0_i32_1 = arith.constant 0 : i32
    return %c0_i32, %c0_i32_0 : i32, i32
  }
  func.func @transform_5(%arg0: i32) -> (i32, i32) {
    %c0_i32 = arith.constant 0 : i32
    %c0_i32_0 = arith.constant 0 : i32
    %c0_i32_1 = arith.constant 0 : i32
    return %c0_i32, %c0_i32_0 : i32, i32
  }
  func.func @transform_6(%arg0: i32) -> (i32, i32) {
    %c0_i32 = arith.constant 0 : i32
    %c0_i32_0 = arith.constant 0 : i32
    %c0_i32_1 = arith.constant 0 : i32
    return %c0_i32, %c0_i32_0 : i32, i32
  }
  func.func @transform_7(%arg0: i32) -> (i32, i32) {
    %c0_i32 = arith.constant 0 : i32
    %c0_i32_0 = arith.constant 0 : i32
    return %c0_i32, %arg0 : i32, i32
  }
  func.func @transform_8(%arg0: i32) -> (i32, i32) {
    %c0_i32 = arith.constant 0 : i32
    %c0_i32_0 = arith.constant 0 : i32
    return %c0_i32, %arg0 : i32, i32
  }
}

</mosaic_0001>

<bundles_post_ra>
// kernel: tpu_custom_call.1
= control target key start
LH: loop header
LB: loop body
LE: loop exit
PB: predicated region body
PF: predicated region fallthrough
CT: control target
= control target key end

     0   :  { %s2268_s0 = inlined_call_operand.vmem [shape: f32[300,32], index: 0, kind: input, shape index: {}]   ;;  %s2269_s1 = inlined_call_operand.vmem [shape: f32[32,128], index: 1, kind: input, shape index: {}]   ;;  %s2270_s2 = inlined_call_operand.vmem [shape: f32[1,128], index: 2, kind: input, shape index: {}]   ;;  %s2271_s3 = inlined_call_operand.vmem [shape: f32[128,128], index: 3, kind: input, shape index: {}]   ;;  %s2272_s4 = inlined_call_operand.vmem [shape: f32[1,128], index: 4, kind: input, shape index: {}]   ;;  %s2273_s5 = inlined_call_operand.vmem [shape: f32[8,128], index: 5, kind: input, shape index: {}]   ;;  %s2274_s6 = inlined_call_operand.vmem [shape: f32[8,1], index: 6, kind: input, shape index: {}]   ;;  %s2275_s7 = inlined_call_operand.hbm [shape: f32[8,300], index: 7, kind: output, shape index: {0}]   ;;  %s2276_s8 = inlined_call_operand.hbm [shape: s32[1,300], index: 8, kind: output, shape index: {1}]  }
   0x1   :  { %2278 = sst [smem:[#allocation8_spill]] %s2268_s0 }
   0x2   :  { %14 = vsyncpa [#allocation3], 0 }
   0x3   :  { %16 = vsyncpa [#allocation3 + $0x1], 0 }
   0x4   :  { %17 = vsyncpa [#allocation5], 0 }
   0x5   :  { %19 = vsyncpa [#allocation5 + $0x1], 0  ;;  %s1874_s27 = smov 0   ;;  %s1876_s28 = smov 0  }
   0x6   :  { %s1878_s29 = smov 0   ;;  %s1880_s30 = smov 0  }
   0x7 LB: > { %s1895_s9 = sadd.s32 4294967295, %s1823_s30   ;;  %s1300_s10 = sadd.s32 4294967294, %s1823_s30   ;;  %s1823_s30 = sphi %s1880_s30, %s2288_s30   ;;  %s1819_s29 = sphi %s1878_s29, %s2287_s29   ;;  %s1815_s28 = sphi %s1876_s28, %s2286_s28   ;;  %s1811_s27 = sphi %s1874_s27, %s2285_s27  }
   0x8   : > { %s1899_s11 = sadd.s32 1, %s1823_s30   ;;  %s184_s12 = sadd.s32 1, %s1819_s29 }
   0x9   : > { %s181_s13 = ssub.s32 %s1823_s30, %s1899_s11  ;;  %p194_p0 = scmp.ne.s32.totalorder %s1819_s29, %s1815_s28 }
   0xa   : > { %p182_p1 = scmp.eq.s32.totalorder %s181_s13, 0  ;;  %p195_p2 = scmp.eq.s32.totalorder %s1895_s9, 1 }
   0xb   : > { %p200_p3 = scmp.ne.s32.totalorder %s1815_s28, %s1811_s27  ;;  %p201_p4 = scmp.eq.s32.totalorder %s1300_s10, 1 }
   0xc   : > { %s1910_s14 = scalar_select %p182_p1, %s1819_s29, %s184_s12  }
   0xd   : > { %p1912_p5 = por %p195_p2, %p194_p0  ;;  %p1916_p6 = por %p201_p4, %p200_p3 }
   0xe   : > { %p1303_p7 = scmp.ge.s32.totalorder %s1823_s30, 1  ;;  %p280_p8 = scmp.lt.s32.totalorder %s1823_s30, 3 }
  0x10   : > { %p281_p9 = pnand %p1303_p7, %p280_p8 }
  0x11   : > { %v379_v0 = vld [vmem:[%s2269_s1] sm:$0xff] (!%p281_p9)  ;;  %v380_v1 = vld [vmem:[%s2269_s1 + $0x8] sm:$0xff] (!%p281_p9)  ;;  %v381_v2 = vld [vmem:[%s2269_s1 + $0x10] sm:$0xff] (!%p281_p9)  ;;  %s1932_s23 = sshll.u32 (!%p281_p9), %s1895_s9, 5  ;;  %vm390_vm0 = vcmask (!%p281_p9), 261120   ;;  %s2281_s0 = sld [smem:[#allocation8_spill]] (!%p281_p9) }
  0x12   : > { %284 = sbr.rel (%p281_p9) target bundleno = 877 (0x36d), region = 48  ;;  %v1612_v3 = vpack.c.bf16 (!%p281_p9), %v380_v1, %v379_v0  ;;  %v382_v4 = vld [vmem:[%s2269_s1 + $0x18] sm:$0xff] (!%p281_p9)  ;;  %p328_p10 = scmp.lt.s32.totalorder (!%p281_p9), %s1932_s23, 37  ;;  %v744_v5 = vld [vmem:[%s2271_s3] sm:$0xff] (!%p281_p9)  ;;  %v745_v6 = vld [vmem:[%s2271_s3 + $0x8] sm:$0xff] (!%p281_p9) }
  0x13   : > { %v1616_v7 = vpack.c.bf16 (!%p281_p9), %v382_v4, %v381_v2  ;;  %v1620_v8 = vpack.c.bf16 (!%p281_p9), %v745_v6, %v744_v5  ;;  %v746_v9 = vld [vmem:[%s2271_s3 + $0x10] sm:$0xff] (!%p281_p9)  ;;  %v747_v10 = vld [vmem:[%s2271_s3 + $0x18] sm:$0xff] (!%p281_p9)  ;;  %v748_v12 = vld [vmem:[%s2271_s3 + $0x20] sm:$0xff] (!%p281_p9)  ;;  %s2162_s24 = sand.u32 (!%p281_p9), 1, %s1815_s28  }
  0x14   : > { %1613 = vmatprep.subr.bf16.mxu0 (!%p281_p9), %v1612_v3  ;;  %v1624_v11 = vpack.c.bf16 (!%p281_p9), %v747_v10, %v746_v9  ;;  %v749_v13 = vld [vmem:[%s2271_s3 + $0x28] sm:$0xff] (!%p281_p9)  ;;  %v750_v16 = vld [vmem:[%s2271_s3 + $0x30] sm:$0xff] (!%p281_p9)  ;;  %v751_v17 = vld [vmem:[%s2271_s3 + $0x38] sm:$0xff] (!%p281_p9)  ;;  %s1304_s25 = sshll.u32 (!%p281_p9), %s2162_s24, 4  ;;  %s2277_s13 = scalar_lea.sflag (!%p281_p9), [#allocation3], %s2162_s24 }
  0x15   : > { %1615 = vmatpush3.bf16.msra.mxu0 (!%p281_p9), %v1612_v3  ;;  %1621 = vmatprep.subr.bf16.mxu1 (!%p281_p9), %v1620_v8  ;;  %v1628_v14 = vpack.c.bf16 (!%p281_p9), %v749_v13, %v748_v12  ;;  %v1632_v20 = vpack.c.bf16 (!%p281_p9), %v751_v17, %v750_v16  ;;  %v752_v21 = vld [vmem:[%s2271_s3 + $0x40] sm:$0xff] (!%p281_p9)  ;;  %v753_v22 = vld [vmem:[%s2271_s3 + $0x48] sm:$0xff] (!%p281_p9)  ;;  %v754_v26 = vld [vmem:[%s2271_s3 + $0x50] sm:$0xff] (!%p281_p9)  ;;  %s2165_s26 = scalar_lea.vmem (!%p281_p9), [#allocation2], %s1304_s25 }
  0x16   : > { %1617 = vmatprep.subr.bf16.mxu0 (!%p281_p9), %v1616_v7  ;;  %1623 = vmatpush3.bf16.msra.mxu1 (!%p281_p9), %v1620_v8  ;;  %v1636_v25 = vpack.c.bf16 (!%p281_p9), %v753_v22, %v752_v21  ;;  %v755_v27 = vld [vmem:[%s2271_s3 + $0x58] sm:$0xff] (!%p281_p9)  ;;  %v756_v31 = vld [vmem:[%s2271_s3 + $0x60] sm:$0xff] (!%p281_p9)  ;;  %v757_v32 = vld [vmem:[%s2271_s3 + $0x68] sm:$0xff] (!%p281_p9) }
  0x17   : > { %1625 = vmatprep.subr.bf16.mxu1 (!%p281_p9), %v1624_v11  ;;  %v1640_v30 = vpack.c.bf16 (!%p281_p9), %v755_v27, %v754_v26  ;;  %v1644_v35 = vpack.c.bf16 (!%p281_p9), %v757_v32, %v756_v31  ;;  %v758_v59 = vld [vmem:[%s2271_s3 + $0x70] sm:$0xff] (!%p281_p9)  ;;  %v759_v60 = vld [vmem:[%s2271_s3 + $0x78] sm:$0xff] (!%p281_p9)  ;;  %v2059_v62 = vld [vmem:[%s2270_s2] ss:$0 sm:$0xff] (!%p281_p9) }
  0x18   : > { %v1648_v61 = vpack.c.bf16 (!%p281_p9), %v759_v60, %v758_v59 }
  0x19   : > { %s329_s21 = scalar_select %p328_p10, %s1932_s23, 37  ;;  %1619 = vmatpush3.bf16.msra.mxu0 %v1616_v7 }
  0x1a   : > { %1627 = vmatpush3.bf16.msra.mxu1 %v1624_v11  ;;  %s1344_s18 = sshll.u32 (%p1912_p5), %s1895_s9, 1 }
  0x1b   : > { %s1307_s10 = sshll.u32 %s329_s21, 3  ;;  %1629 = vmatprep.subr.bf16.mxu1 %v1628_v14  ;;  %s1178_s19 = ssub.s32 (%p1912_p5), 3, %s1344_s18 }
  0x1c   : > { %s1960_s17 = scalar_lea.vmem %s2281_s0, %s1307_s10  ;;  %s1305_s10 = sshll.u32 %s2162_s24, 1 }
  0x1d   : > { %v347_v15 = vld [vmem:[%s1960_s17] sm:$0xff]  ;;  %v348_v18 = vld [vmem:[%s1960_s17 + $0x8] sm:$0xff]  ;;  %v349_v19 = vld [vmem:[%s1960_s17 + $0x10] sm:$0xff]  ;;  %s2170_s12 = scalar_lea.vmem [#allocation4], %s1305_s10  ;;  %p1179_p11 = scmp.lt.s32.totalorder (%p1912_p5), %s1178_s19, 2 }
  0x1e   : > { %1484 = vmatprep.mubr.msk.f32.mxu0 %vm390_vm0, %v347_v15  ;;  %v350_v23 = vld [vmem:[%s1960_s17 + $0x18] sm:$0xff]  ;;  %v351_v24 = vld [vmem:[%s1960_s17 + $0x20] sm:$0xff]  ;;  %1631 = vmatpush3.bf16.msra.mxu1 %v1628_v14  ;;  %v352_v28 = vld [vmem:[%s1960_s17 + $0x28] sm:$0xff] }
  0x1f   : > { %1485 = vmatmul.mubr.msk.f32.vlgmr.msra.gmra.mrb[0].mxu0 %vm390_vm0, %v348_v18  ;;  %1633 = vmatprep.subr.bf16.mxu1 %v1632_v20  ;;  %v353_v29 = vld [vmem:[%s1960_s17 + $0x30] sm:$0xff]  ;;  %v354_v33 = vld [vmem:[%s1960_s17 + $0x38] sm:$0xff]  ;;  %v355_v34 = vld [vmem:[%s1960_s17 + $0x40] sm:$0xff] }
  0x20   : > { %1487 = vmatprep.mubr.msk.f32.mxu0 %vm390_vm0, %v349_v19  ;;  %v356_v36 = vld [vmem:[%s1960_s17 + $0x48] sm:$0xff]  ;;  %v357_v37 = vld [vmem:[%s1960_s17 + $0x50] sm:$0xff]  ;;  %v358_v38 = vld [vmem:[%s1960_s17 + $0x58] sm:$0xff] }
  0x21   : > { %v359_v39 = vld [vmem:[%s1960_s17 + $0x60] sm:$0xff]  ;;  %v360_v40 = vld [vmem:[%s1960_s17 + $0x68] sm:$0xff]  ;;  %v361_v41 = vld [vmem:[%s1960_s17 + $0x70] sm:$0xff] }
  0x22   : > { %1635 = vmatpush3.bf16.msra.mxu1 %v1632_v20  ;;  %v362_v42 = vld [vmem:[%s1960_s17 + $0x78] sm:$0xff]  ;;  %v363_v43 = vld [vmem:[%s1960_s17 + $0x80] sm:$0xff]  ;;  %v364_v44 = vld [vmem:[%s1960_s17 + $0x88] sm:$0xff] }
  0x23   : > { %1488 = vmatmul.mubr.msk.f32.gmra.mrb[2].mxu0 %vm390_vm0, %v350_v23  ;;  %1637 = vmatprep.subr.bf16.mxu1 %v1636_v25  ;;  %v365_v45 = vld [vmem:[%s1960_s17 + $0x90] sm:$0xff]  ;;  %v366_v46 = vld [vmem:[%s1960_s17 + $0x98] sm:$0xff]  ;;  %v367_v47 = vld [vmem:[%s1960_s17 + $0xa0] sm:$0xff] }
  0x24   : > { %1490 = vmatprep.mubr.msk.f32.mxu0 %vm390_vm0, %v351_v24  ;;  %v368_v48 = vld [vmem:[%s1960_s17 + $0xa8] sm:$0xff]  ;;  %v369_v49 = vld [vmem:[%s1960_s17 + $0xb0] sm:$0xff]  ;;  %v370_v50 = vld [vmem:[%s1960_s17 + $0xb8] sm:$0xff] }
  0x25   : > { %v371_v51 = vld [vmem:[%s1960_s17 + $0xc0] sm:$0xff]  ;;  %v372_v52 = vld [vmem:[%s1960_s17 + $0xc8] sm:$0xff]  ;;  %v373_v53 = vld [vmem:[%s1960_s17 + $0xd0] sm:$0xff] }
  0x26   : > { %1639 = vmatpush3.bf16.msra.mxu1 %v1636_v25  ;;  %v374_v54 = vld [vmem:[%s1960_s17 + $0xd8] sm:$0xff]  ;;  %v375_v55 = vld [vmem:[%s1960_s17 + $0xe0] sm:$0xff]  ;;  %v376_v56 = vld [vmem:[%s1960_s17 + $0xe8] sm:$0xff] }
  0x27   : > { %1491 = vmatmul.mubr.msk.f32.gmra.mrb[4].mxu0 %vm390_vm0, %v352_v28  ;;  %1641 = vmatprep.subr.bf16.mxu1 %v1640_v30  ;;  %v377_v57 = vld [vmem:[%s1960_s17 + $0xf0] sm:$0xff]  ;;  %v378_v58 = vld [vmem:[%s1960_s17 + $0xf8] sm:$0xff] }
  0x28   : > { %1493 = vmatprep.mubr.msk.f32.mxu0 %vm390_vm0, %v353_v29 }
  0x2a   : > { %1643 = vmatpush3.bf16.msra.mxu1 %v1640_v30 }
  0x2b   : > { %1494 = vmatmul.mubr.msk.f32.gmra.mrb[6].mxu0 %vm390_vm0, %v354_v33  ;;  %1645 = vmatprep.subr.bf16.mxu1 %v1644_v35 }
  0x2c   : > { %1496 = vmatprep.mubr.msk.f32.mxu0 %vm390_vm0, %v355_v34 }
  0x2e   : > { %1647 = vmatpush3.bf16.msra.mxu1 %v1644_v35 }
  0x2f   : > { %1497 = vmatmul.mubr.msk.f32.gmra.mrb[8].mxu0 %vm390_vm0, %v356_v36  ;;  %1649 = vmatprep.subr.bf16.mxu1 %v1648_v61 }
  0x30   : > { %1499 = vmatprep.mubr.msk.f32.mxu0 %vm390_vm0, %v357_v37 }
  0x32   : > { %1651 = vmatpush3.bf16.msra.mxu1 %v1648_v61 }
  0x33   : > { %1500 = vmatmul.mubr.msk.f32.gmra.mrb[10].mxu0 %vm390_vm0, %v358_v38 }
  0x34   : > { %1502 = vmatprep.mubr.msk.f32.mxu0 %vm390_vm0, %v359_v39 }
  0x37   : > { %1503 = vmatmul.mubr.msk.f32.gmra.mrb[12].mxu0 %vm390_vm0, %v360_v40 }
  0x38   : > { %1505 = vmatprep.mubr.msk.f32.mxu0 %vm390_vm0, %v361_v41 }
  0x3b   : > { %1506 = vmatmul.mubr.msk.f32.gmra.mrb[14].mxu0 %vm390_vm0, %v362_v42 }
  0x3c   : > { %1508 = vmatprep.mubr.msk.f32.mxu0 %vm390_vm0, %v363_v43 }
  0x3f   : > { %1509 = vmatmul.mubr.msk.f32.gmra.mrb[16].mxu0 %vm390_vm0, %v364_v44 }
  0x40   : > { %1511 = vmatprep.mubr.msk.f32.mxu0 %vm390_vm0, %v365_v45 }
  0x43   : > { %1512 = vmatmul.mubr.msk.f32.gmra.mrb[18].mxu0 %vm390_vm0, %v366_v46 }
  0x44   : > { %1514 = vmatprep.mubr.msk.f32.mxu0 %vm390_vm0, %v367_v47 }
  0x47   : > { %1515 = vmatmul.mubr.msk.f32.gmra.mrb[20].mxu0 %vm390_vm0, %v368_v48 }
  0x48   : > { %1517 = vmatprep.mubr.msk.f32.mxu0 %vm390_vm0, %v369_v49 }
  0x4b   : > { %1518 = vmatmul.mubr.msk.f32.gmra.mrb[22].mxu0 %vm390_vm0, %v370_v50 }
  0x4c   : > { %1520 = vmatprep.mubr.msk.f32.mxu0 %vm390_vm0, %v371_v51 }
  0x4f   : > { %1521 = vmatmul.mubr.msk.f32.gmra.mrb[24].mxu0 %vm390_vm0, %v372_v52 }
  0x50   : > { %1523 = vmatprep.mubr.msk.f32.mxu0 %vm390_vm0, %v373_v53 }
  0x53   : > { %1524 = vmatmul.mubr.msk.f32.gmra.mrb[26].mxu0 %vm390_vm0, %v374_v54 }
  0x54   : > { %1526 = vmatprep.mubr.msk.f32.mxu0 %vm390_vm0, %v375_v55 }
  0x57   : > { %1527 = vmatmul.mubr.msk.f32.gmra.mrb[28].mxu0 %vm390_vm0, %v376_v56 }
  0x58   : > { %1529 = vmatprep.mubr.msk.f32.mxu0 %vm390_vm0, %v377_v57 }
  0x5b   : > { %1530 = vmatmul.mubr.msk.f32.gmra.mrb[30].mxu0 %vm390_vm0, %v378_v58 }
  0xf2   : > { %v1486_v63 = vpop.f32.mrb[0].mxu0 }
  0xf3   : > { %v559_v0 = vadd.f32 %v1486_v63, %v2059_v62  ;;  %v553_v1 = vpop.f32.mrb[1].mxu0 }
  0xf4   : > { %v554_v2 = vadd.f32 %v2059_v62, %v553_v1 }
  0xf5   : > { %v713_v5 = vmax.f32 %v559_v0, 0.0 }
  0xf6   : > { %v1489_v3 = vpop.f32.mrb[2].mxu0  ;;  %v712_v4 = vmax.f32 %v554_v2, 0.0 }
  0xf7   : > { %v569_v6 = vadd.f32 %v1489_v3, %v2059_v62  ;;  %v563_v7 = vpop.f32.mrb[3].mxu0 }
  0xf8   : > { %v564_v8 = vadd.f32 %v2059_v62, %v563_v7  ;;  %1564 = vmatprep.mubr.f32.mxu1 %v712_v4 }
  0xf9   : > { %1565 = vmatmul.mubr.f32.vlgmr.msra.gmra.mrb[0].mxu1 %v713_v5  ;;  %v715_v11 = vmax.f32 %v569_v6, 0.0 }
  0xfa   : > { %v714_v9 = vmax.f32 %v564_v8, 0.0  ;;  %v1492_v10 = vpop.f32.mrb[4].mxu0 }
  0xfb   : > { %v579_v12 = vadd.f32 %v1492_v10, %v2059_v62  ;;  %v573_v13 = vpop.f32.mrb[5].mxu0 }
  0xfc   : > { %v574_v14 = vadd.f32 %v2059_v62, %v573_v13  ;;  %1567 = vmatprep.mubr.f32.mxu1 %v714_v9 }
  0xfd   : > { %1568 = vmatmul.mubr.f32.gmra.mrb[2].mxu1 %v715_v11  ;;  %v717_v17 = vmax.f32 %v579_v12, 0.0 }
  0xfe   : > { %v716_v15 = vmax.f32 %v574_v14, 0.0  ;;  %v1495_v16 = vpop.f32.mrb[6].mxu0 }
  0xff   : > { %v589_v18 = vadd.f32 %v1495_v16, %v2059_v62  ;;  %v583_v19 = vpop.f32.mrb[7].mxu0 }
 0x100   : > { %v584_v20 = vadd.f32 %v2059_v62, %v583_v19  ;;  %1570 = vmatprep.mubr.f32.mxu1 %v716_v15 }
 0x101   : > { %1571 = vmatmul.mubr.f32.gmra.mrb[4].mxu1 %v717_v17  ;;  %v719_v23 = vmax.f32 %v589_v18, 0.0 }
 0x102   : > { %v718_v21 = vmax.f32 %v584_v20, 0.0  ;;  %v1498_v22 = vpop.f32.mrb[8].mxu0 }
 0x103   : > { %v599_v24 = vadd.f32 %v1498_v22, %v2059_v62  ;;  %v593_v25 = vpop.f32.mrb[9].mxu0 }
 0x104   : > { %v594_v26 = vadd.f32 %v2059_v62, %v593_v25  ;;  %1573 = vmatprep.mubr.f32.mxu1 %v718_v21 }
 0x105   : > { %1574 = vmatmul.mubr.f32.gmra.mrb[6].mxu1 %v719_v23  ;;  %v721_v29 = vmax.f32 %v599_v24, 0.0 }
 0x106   : > { %v720_v27 = vmax.f32 %v594_v26, 0.0  ;;  %v1501_v28 = vpop.f32.mrb[10].mxu0 }
 0x107   : > { %v609_v30 = vadd.f32 %v1501_v28, %v2059_v62  ;;  %v603_v31 = vpop.f32.mrb[11].mxu0 }
 0x108   : > { %v604_v32 = vadd.f32 %v2059_v62, %v603_v31  ;;  %1576 = vmatprep.mubr.f32.mxu1 %v720_v27 }
 0x109   : > { %1577 = vmatmul.mubr.f32.gmra.mrb[8].mxu1 %v721_v29  ;;  %v723_v35 = vmax.f32 %v609_v30, 0.0 }
 0x10a   : > { %v722_v33 = vmax.f32 %v604_v32, 0.0  ;;  %v1504_v34 = vpop.f32.mrb[12].mxu0  ;;  %v2096_v32 = vld [vmem:[%s2273_s5] sm:$0xff] }
 0x10b   : > { %v619_v36 = vadd.f32 %v1504_v34, %v2059_v62  ;;  %v613_v37 = vpop.f32.mrb[13].mxu0  ;;  %1474 = vmatprep.mubr.f32.mxu0 %v2096_v32  ;;  %v1825_v34 = vmov 0  }
 0x10c   : > { %v614_v38 = vadd.f32 %v2059_v62, %v613_v37  ;;  %1579 = vmatprep.mubr.f32.mxu1 %v722_v33  ;;  %v1025_v33 = vld [vmem:[%s2274_s6] sm:$0xff]  ;;  %1728 = vset.pattern.permute.xlu0 %v1825_v34 }
 0x10d   : > { %1580 = vmatmul.mubr.f32.gmra.mrb[10].mxu1 %v723_v35  ;;  %v725_v41 = vmax.f32 %v619_v36, 0.0  ;;  %1028 = vperm.xlu0 %1728, %v1025_v33  }
 0x10e   : > { %v724_v39 = vmax.f32 %v614_v38, 0.0  ;;  %v1507_v40 = vpop.f32.mrb[14].mxu0 }
 0x10f   : > { %v629_v42 = vadd.f32 %v1507_v40, %v2059_v62  ;;  %v623_v43 = vpop.f32.mrb[15].mxu0 }
 0x110   : > { %v624_v44 = vadd.f32 %v2059_v62, %v623_v43  ;;  %1582 = vmatprep.mubr.f32.mxu1 %v724_v39 }
 0x111   : > { %1583 = vmatmul.mubr.f32.gmra.mrb[12].mxu1 %v725_v41  ;;  %v727_v47 = vmax.f32 %v629_v42, 0.0 }
 0x112   : > { %v726_v45 = vmax.f32 %v624_v44, 0.0  ;;  %v1510_v46 = vpop.f32.mrb[16].mxu0 }
 0x113   : > { %v639_v48 = vadd.f32 %v1510_v46, %v2059_v62  ;;  %v633_v49 = vpop.f32.mrb[17].mxu0 }
 0x114   : > { %v634_v50 = vadd.f32 %v2059_v62, %v633_v49  ;;  %1585 = vmatprep.mubr.f32.mxu1 %v726_v45 }
 0x115   : > { %1586 = vmatmul.mubr.f32.gmra.mrb[14].mxu1 %v727_v47  ;;  %v729_v53 = vmax.f32 %v639_v48, 0.0 }
 0x116   : > { %v728_v51 = vmax.f32 %v634_v50, 0.0  ;;  %v1513_v52 = vpop.f32.mrb[18].mxu0 }
 0x117   : > { %v649_v54 = vadd.f32 %v1513_v52, %v2059_v62  ;;  %v643_v55 = vpop.f32.mrb[19].mxu0 }
 0x118   : > { %v644_v56 = vadd.f32 %v2059_v62, %v643_v55  ;;  %1588 = vmatprep.mubr.f32.mxu1 %v728_v51 }
 0x119   : > { %v731_v57 = vmax.f32 %v649_v54, 0.0  ;;  %1589 = vmatmul.mubr.f32.gmra.mrb[16].mxu1 %v729_v53 }
 0x11a   : > { %v730_v58 = vmax.f32 %v644_v56, 0.0  ;;  %v1516_v59 = vpop.f32.mrb[20].mxu0 }
 0x11b   : > { %v659_v60 = vadd.f32 %v1516_v59, %v2059_v62  ;;  %v653_v61 = vpop.f32.mrb[21].mxu0 }
 0x11c   : > { %1591 = vmatprep.mubr.f32.mxu1 %v730_v58  ;;  %v654_v63 = vadd.f32 %v2059_v62, %v653_v61 }
 0x11d   : > { %1592 = vmatmul.mubr.f32.gmra.mrb[18].mxu1 %v731_v57  ;;  %v733_v0 = vmax.f32 %v659_v60, 0.0 }
 0x11e   : > { %v732_v1 = vmax.f32 %v654_v63, 0.0  ;;  %v1519_v2 = vpop.f32.mrb[22].mxu0 }
 0x11f   : > { %v669_v3 = vadd.f32 %v1519_v2, %v2059_v62  ;;  %v663_v4 = vpop.f32.mrb[23].mxu0 }
 0x120   : > { %1594 = vmatprep.mubr.f32.mxu1 %v732_v1  ;;  %v664_v5 = vadd.f32 %v2059_v62, %v663_v4 }
 0x121   : > { %1595 = vmatmul.mubr.f32.gmra.mrb[20].mxu1 %v733_v0  ;;  %v735_v6 = vmax.f32 %v669_v3, 0.0 }
 0x122   : > { %v734_v7 = vmax.f32 %v664_v5, 0.0  ;;  %v1522_v8 = vpop.f32.mrb[24].mxu0 }
 0x123   : > { %v679_v9 = vadd.f32 %v1522_v8, %v2059_v62  ;;  %v673_v10 = vpop.f32.mrb[25].mxu0 }
 0x124   : > { %1597 = vmatprep.mubr.f32.mxu1 %v734_v7  ;;  %v674_v11 = vadd.f32 %v2059_v62, %v673_v10 }
 0x125   : > { %1598 = vmatmul.mubr.f32.gmra.mrb[22].mxu1 %v735_v6  ;;  %v737_v12 = vmax.f32 %v679_v9, 0.0 }
 0x126   : > { %v736_v13 = vmax.f32 %v674_v11, 0.0  ;;  %v1525_v14 = vpop.f32.mrb[26].mxu0 }
 0x127   : > { %v689_v15 = vadd.f32 %v1525_v14, %v2059_v62  ;;  %v683_v16 = vpop.f32.mrb[27].mxu0 }
 0x128   : > { %1600 = vmatprep.mubr.f32.mxu1 %v736_v13  ;;  %v684_v17 = vadd.f32 %v2059_v62, %v683_v16 }
 0x129   : > { %1601 = vmatmul.mubr.f32.gmra.mrb[24].mxu1 %v737_v12  ;;  %v739_v18 = vmax.f32 %v689_v15, 0.0 }
 0x12a   : > { %v738_v19 = vmax.f32 %v684_v17, 0.0  ;;  %v1528_v20 = vpop.f32.mrb[28].mxu0 }
 0x12b   : > { %v699_v21 = vadd.f32 %v1528_v20, %v2059_v62  ;;  %v693_v22 = vpop.f32.mrb[29].mxu0 }
 0x12c   : > { %1603 = vmatprep.mubr.f32.mxu1 %v738_v19  ;;  %v694_v23 = vadd.f32 %v2059_v62, %v693_v22 }
 0x12d   : > { %1604 = vmatmul.mubr.f32.gmra.mrb[26].mxu1 %v739_v18  ;;  %v741_v24 = vmax.f32 %v699_v21, 0.0 }
 0x12e   : > { %v740_v25 = vmax.f32 %v694_v23, 0.0  ;;  %v1531_v26 = vpop.f32.mrb[30].mxu0 }
 0x12f   : > { %v709_v27 = vadd.f32 %v1531_v26, %v2059_v62  ;;  %v703_v28 = vpop.f32.mrb[31].mxu0 }
 0x130   : > { %1606 = vmatprep.mubr.f32.mxu1 %v740_v25  ;;  %v704_v29 = vadd.f32 %v2059_v62, %v703_v28  ;;  %v2105_v62 = vld [vmem:[%s2272_s4] ss:$0 sm:$0xff] }
 0x131   : > { %1607 = vmatmul.mubr.f32.gmra.mrb[28].mxu1 %v741_v24  ;;  %v743_v30 = vmax.f32 %v709_v27, 0.0 }
 0x132   : > { %v742_v31 = vmax.f32 %v704_v29, 0.0 }
 0x134   : > { %1609 = vmatprep.mubr.f32.mxu1 %v742_v31 }
 0x135   : > { %1610 = vmatmul.mubr.f32.gmra.mrb[30].mxu1 %v743_v30 }
 0x1cc   : > { %v1566_v35 = vpop.f32.mrb[0].mxu1 }
 0x1cd   : > { %v839_v36 = vadd.f32 %v1566_v35, %v2105_v62  ;;  %v833_v37 = vpop.f32.mrb[1].mxu1 }
 0x1ce   : > { %v834_v38 = vadd.f32 %v2105_v62, %v833_v37 }
 0x1cf   : > { %v993_v39 = vmax.f32 %v839_v36, 0.0 }
 0x1d0   : > { %v992_v40 = vmax.f32 %v834_v38, 0.0  ;;  %v1569_v41 = vpop.f32.mrb[2].mxu1 }
 0x1d1   : > { %v849_v42 = vadd.f32 %v1569_v41, %v2105_v62  ;;  %v843_v43 = vpop.f32.mrb[3].mxu1 }
 0x1d2   : > { %v1654_v44 = vpack.c.bf16 %v993_v39, %v992_v40  ;;  %v844_v45 = vadd.f32 %v2105_v62, %v843_v43 }
 0x1d3   : > { %v995_v46 = vmax.f32 %v849_v42, 0.0 }
 0x1d4   : > { %v994_v47 = vmax.f32 %v844_v45, 0.0  ;;  %v1572_v48 = vpop.f32.mrb[4].mxu1 }
 0x1d5   : > { %v859_v49 = vadd.f32 %v1572_v48, %v2105_v62  ;;  %v853_v50 = vpop.f32.mrb[5].mxu1 }
 0x1d6   : > { %v2112_v51 = vpack.c.bf16 %v995_v46, %v994_v47  ;;  %v854_v52 = vadd.f32 %v2105_v62, %v853_v50 }
 0x1d7   : > { %v997_v53 = vmax.f32 %v859_v49, 0.0 }
 0x1d8   : > { %v996_v54 = vmax.f32 %v854_v52, 0.0  ;;  %v1575_v55 = vpop.f32.mrb[6].mxu1 }
 0x1d9   : > { %v869_v56 = vadd.f32 %v1575_v55, %v2105_v62  ;;  %v863_v57 = vpop.f32.mrb[7].mxu1 }
 0x1da   : > { %v2116_v58 = vpack.c.bf16 %v997_v53, %v996_v54  ;;  %v864_v59 = vadd.f32 %v2105_v62, %v863_v57 }
 0x1db   : > { %v999_v60 = vmax.f32 %v869_v56, 0.0 }
 0x1dc   : > { %v998_v61 = vmax.f32 %v864_v59, 0.0  ;;  %v1578_v63 = vpop.f32.mrb[8].mxu1 }
 0x1dd   : > { %v879_v0 = vadd.f32 %v1578_v63, %v2105_v62  ;;  %v873_v1 = vpop.f32.mrb[9].mxu1 }
 0x1de   : > { %v2120_v2 = vpack.c.bf16 %v999_v60, %v998_v61  ;;  %v874_v3 = vadd.f32 %v2105_v62, %v873_v1 }
 0x1df   : > { %v1001_v4 = vmax.f32 %v879_v0, 0.0 }
 0x1e0   : > { %v1000_v5 = vmax.f32 %v874_v3, 0.0  ;;  %v1581_v6 = vpop.f32.mrb[10].mxu1 }
 0x1e1   : > { %v889_v7 = vadd.f32 %v1581_v6, %v2105_v62  ;;  %v883_v8 = vpop.f32.mrb[11].mxu1 }
 0x1e2   : > { %v2124_v9 = vpack.c.bf16 %v1001_v4, %v1000_v5  ;;  %v884_v10 = vadd.f32 %v2105_v62, %v883_v8 }
 0x1e3   : > { %v1003_v11 = vmax.f32 %v889_v7, 0.0 }
 0x1e4   : > { %v1002_v12 = vmax.f32 %v884_v10, 0.0  ;;  %v1584_v13 = vpop.f32.mrb[12].mxu1 }
 0x1e5   : > { %v899_v14 = vadd.f32 %v1584_v13, %v2105_v62  ;;  %v893_v15 = vpop.f32.mrb[13].mxu1 }
 0x1e6   : > { %v2128_v16 = vpack.c.bf16 %v1003_v11, %v1002_v12  ;;  %v894_v17 = vadd.f32 %v2105_v62, %v893_v15 }
 0x1e7   : > { %v1005_v18 = vmax.f32 %v899_v14, 0.0 }
 0x1e8   : > { %v1004_v19 = vmax.f32 %v894_v17, 0.0  ;;  %v1587_v20 = vpop.f32.mrb[14].mxu1 }
 0x1e9   : > { %v909_v21 = vadd.f32 %v1587_v20, %v2105_v62  ;;  %v903_v22 = vpop.f32.mrb[15].mxu1 }
 0x1ea   : > { %v2132_v23 = vpack.c.bf16 %v1005_v18, %v1004_v19  ;;  %v904_v24 = vadd.f32 %v2105_v62, %v903_v22 }
 0x1eb   : > { %v1007_v25 = vmax.f32 %v909_v21, 0.0 }
 0x1ec   : > { %v1006_v26 = vmax.f32 %v904_v24, 0.0  ;;  %v1590_v27 = vpop.f32.mrb[16].mxu1 }
 0x1ed   : > { %v919_v28 = vadd.f32 %v1590_v27, %v2105_v62  ;;  %v913_v29 = vpop.f32.mrb[17].mxu1 }
 0x1ee   : > { %v2136_v30 = vpack.c.bf16 %v1007_v25, %v1006_v26  ;;  %v914_v31 = vadd.f32 %v2105_v62, %v913_v29 }
 0x1ef   : > { %v1009_v33 = vmax.f32 %v919_v28, 0.0 }
 0x1f0   : > { %v1008_v34 = vmax.f32 %v914_v31, 0.0  ;;  %v1593_v35 = vpop.f32.mrb[18].mxu1 }
 0x1f1   : > { %v929_v36 = vadd.f32 %v1593_v35, %v2105_v62  ;;  %v923_v37 = vpop.f32.mrb[19].mxu1 }
 0x1f2   : > { %v1652_v38 = vpack.c.bf16 %v1009_v33, %v1008_v34  ;;  %v924_v39 = vadd.f32 %v2105_v62, %v923_v37 }
 0x1f3   : > { %v1011_v40 = vmax.f32 %v929_v36, 0.0 }
 0x1f4   : > { %v1010_v41 = vmax.f32 %v924_v39, 0.0  ;;  %1653 = vmatprep.subr.bf16.mxu0 %v1652_v38  ;;  %v1596_v42 = vpop.f32.mrb[20].mxu1 }
 0x1f5   : > { %1655 = vmatpush3.bf16.xpose.msra.mxu0 %v1654_v44  ;;  %v939_v43 = vadd.f32 %v1596_v42, %v2105_v62  ;;  %v933_v45 = vpop.f32.mrb[21].mxu1 }
 0x1f6   : > { %v1656_v46 = vpack.c.bf16 %v1011_v40, %v1010_v41  ;;  %v934_v47 = vadd.f32 %v2105_v62, %v933_v45 }
 0x1f7   : > { %v1013_v48 = vmax.f32 %v939_v43, 0.0 }
 0x1f8   : > { %1657 = vmatprep.subr.bf16.mxu0 %v1656_v46  ;;  %v1012_v49 = vmax.f32 %v934_v47, 0.0  ;;  %v1599_v50 = vpop.f32.mrb[22].mxu1 }
 0x1f9   : > { %v949_v52 = vadd.f32 %v1599_v50, %v2105_v62  ;;  %v943_v53 = vpop.f32.mrb[23].mxu1 }
 0x1fa   : > { %v1660_v54 = vpack.c.bf16 %v1013_v48, %v1012_v49  ;;  %v944_v55 = vadd.f32 %v2105_v62, %v943_v53  ;;  %v1826_v48 = vmov 1966171168  }
 0x1fb   : > { %v1015_v56 = vmax.f32 %v949_v52, 0.0  ;;  %v1146_v49 = vunpack.c.l.s4 %v1826_v48 }
 0x1fc   : > { %v1014_v57 = vmax.f32 %v944_v55, 0.0  ;;  %v1602_v59 = vpop.f32.mrb[24].mxu1 }
 0x1fd   : > { %1659 = vmatpush3.bf16.xpose.msra.mxu0 %v2112_v51  ;;  %v959_v44 = vadd.f32 %v1602_v59, %v2105_v62  ;;  %v953_v60 = vpop.f32.mrb[25].mxu1  ;;  %v1147_v55 = vunpack.c.0.s8 %v1146_v49 }
 0x1fe   : > { %1661 = vmatprep.subr.bf16.mxu0 %v1660_v54  ;;  %v1664_v61 = vpack.c.bf16 %v1015_v56, %v1014_v57  ;;  %v954_v63 = vadd.f32 %v2105_v62, %v953_v60 }
 0x1ff   : > { %v1017_v0 = vmax.f32 %v959_v44, 0.0 }
 0x200   : > { %v1016_v1 = vmax.f32 %v954_v63, 0.0  ;;  %v1605_v3 = vpop.f32.mrb[26].mxu1 }
 0x201   : > { %v969_v4 = vadd.f32 %v1605_v3, %v2105_v62  ;;  %v963_v5 = vpop.f32.mrb[27].mxu1 }
 0x202   : > { %v1668_v6 = vpack.c.bf16 %v1017_v0, %v1016_v1  ;;  %v964_v7 = vadd.f32 %v2105_v62, %v963_v5 }
 0x203   : > { %v1019_v8 = vmax.f32 %v969_v4, 0.0 }
 0x204   : > { %v1018_v10 = vmax.f32 %v964_v7, 0.0  ;;  %v1608_v11 = vpop.f32.mrb[28].mxu1 }
 0x205   : > { %1663 = vmatpush3.bf16.xpose.msra.mxu0 %v2116_v58  ;;  %v979_v51 = vadd.f32 %v1608_v11, %v2105_v62  ;;  %v973_v12 = vpop.f32.mrb[29].mxu1 }
 0x206   : > { %1665 = vmatprep.subr.bf16.mxu0 %v1664_v61  ;;  %v1672_v13 = vpack.c.bf16 %v1019_v8, %v1018_v10  ;;  %v974_v14 = vadd.f32 %v2105_v62, %v973_v12 }
 0x207   : > { %v1021_v15 = vmax.f32 %v979_v51, 0.0 }
 0x208   : > { %v1020_v17 = vmax.f32 %v974_v14, 0.0  ;;  %v1611_v18 = vpop.f32.mrb[30].mxu1 }
 0x209   : > { %v989_v19 = vadd.f32 %v1611_v18, %v2105_v62  ;;  %v983_v20 = vpop.f32.mrb[31].mxu1 }
 0x20a   : > { %v1676_v21 = vpack.c.bf16 %v1021_v15, %v1020_v17  ;;  %v984_v22 = vadd.f32 %v2105_v62, %v983_v20  ;;  %v1029_v62 = vpop.permute.xlu0 %1028 }
 0x20b   : > { %v1023_v24 = vmax.f32 %v989_v19, 0.0 }
 0x20c   : > { %v1022_v25 = vmax.f32 %v984_v22, 0.0 }
 0x20d   : > { %1667 = vmatpush3.bf16.xpose.msra.mxu0 %v2120_v2 }
 0x20e   : > { %1669 = vmatprep.subr.bf16.mxu0 %v1668_v6  ;;  %v1680_v58 = vpack.c.bf16 %v1023_v24, %v1022_v25 }
 0x215   : > { %1671 = vmatpush3.bf16.xpose.msra.mxu0 %v2124_v9 }
 0x216   : > { %1673 = vmatprep.subr.bf16.mxu0 %v1672_v13 }
 0x21d   : > { %1675 = vmatpush3.bf16.xpose.msra.mxu0 %v2128_v16 }
 0x21e   : > { %1677 = vmatprep.subr.bf16.mxu0 %v1676_v21 }
 0x225   : > { %1679 = vmatpush3.bf16.xpose.msra.mxu0 %v2132_v23 }
 0x226   : > { %1681 = vmatprep.subr.bf16.mxu0 %v1680_v58 }
 0x22d   : > { %1683 = vmatpush3.bf16.xpose.msra.mxu0 %v2136_v30  ;;  %v1116_v30 = vlaneseq }
 0x22f   : > { %v1117_v36 = vshrl.u32 %v1116_v30, 7  ;;  %vm1161_vm11 = vcmp.lt.s32.totalorder %v1116_v30, 256 }
 0x231   : > { %v1150_v60 = vsub.s32 %v1147_v55, %v1117_v36 }
 0x234   : > { %1475 = vmatmul.mubr.f32.vlgmr.msra.gmra.mrb[32].mxu0 %v2096_v32 }
 0x307   : > { %v1097_v2 = vpop.f32.mrb[32].mxu0 }
 0x308   : > { %v1098_v26 = vadd.f32 %v1097_v2, %v1029_v62  ;;  %v1099_v27 = vpop.f32.mrb[33].mxu0 }
 0x309   : > { %v1100_v9 = vadd.f32 %v1099_v27, %v1029_v62 }
 0x30a   : > { %1102 = vst [vmem:[%s2165_s26] sm:$0xff] %v1098_v26  ;;  %v1104_v16 = vrot.slane %v1098_v26, 4 }
 0x30b   : > { %1103 = vst [vmem:[%s2165_s26 + $0x8] sm:$0xff] %v1100_v9  ;;  %v1110_v23 = vrot.slane %v1100_v9, 4 }
 0x30c   : > { %v1105_v28 = vmax.f32 %v1098_v26, %v1104_v16 }
 0x30d   : > { %v1111_v29 = vmax.f32 %v1100_v9, %v1110_v23 }
 0x30e   : > { %v1106_v32 = vrot.slane %v1105_v28, 2 }
 0x30f   : > { %v1112_v31 = vrot.slane %v1111_v29, 2 }
 0x310   : > { %v1107_v33 = vmax.f32 %v1105_v28, %v1106_v32 }
 0x311   : > { %v1113_v34 = vmax.f32 %v1111_v29, %v1112_v31 }
 0x312   : > { %v1108_v35 = vrot.slane %v1107_v33, 1 }
 0x313   : > { %v1114_v37 = vrot.slane %v1113_v34, 1 }
 0x314   : > { %v1109_v38 = vmax.f32 %v1107_v33, %v1108_v35 }
 0x315   : > { %v1115_v39 = vmax.f32 %v1113_v34, %v1114_v37 }
 0x316   : > { %vm1118_vm1 = vcmp.eq.f32.partialorder %v1098_v26, %v1109_v38 }
 0x317   : > { %v1120_v40 = vsel %vm1118_vm1, %v1117_v36, 8  ;;  %vm1119_vm2 = vcmp.eq.f32.partialorder %v1100_v9, %v1115_v39 }
 0x318   : > { %v1122_v41 = vrot.slane %v1120_v40, 4  ;;  %v1121_v42 = vsel %vm1119_vm2, %v1117_v36, 8 }
 0x319   : > { %v1131_v43 = vrot.slane %v1121_v42, 4 }
 0x31a   : > { %vm1123_vm3 = vcmp.lt.s32.totalorder %v1120_v40, %v1122_v41 }
 0x31b   : > { %v1124_v45 = vsel %vm1123_vm3, %v1120_v40, %v1122_v41  ;;  %vm1132_vm4 = vcmp.lt.s32.totalorder %v1121_v42, %v1131_v43 }
 0x31c   : > { %v1125_v46 = vrot.slane %v1124_v45, 2  ;;  %v1133_v47 = vsel %vm1132_vm4, %v1121_v42, %v1131_v43 }
 0x31d   : > { %v1134_v50 = vrot.slane %v1133_v47, 2 }
 0x31e   : > { %vm1126_vm5 = vcmp.lt.s32.totalorder %v1124_v45, %v1125_v46 }
 0x31f   : > { %v1127_v52 = vsel %vm1126_vm5, %v1124_v45, %v1125_v46  ;;  %vm1135_vm6 = vcmp.lt.s32.totalorder %v1133_v47, %v1134_v50 }
 0x320   : > { %v1128_v53 = vrot.slane %v1127_v52, 1  ;;  %v1136_v54 = vsel %vm1135_vm6, %v1133_v47, %v1134_v50 }
 0x321   : > { %v1137_v56 = vrot.slane %v1136_v54, 1 }
 0x322   : > { %vm1129_vm7 = vcmp.lt.s32.totalorder %v1127_v52, %v1128_v53 }
 0x323   : > { %v1130_v57 = vsel %vm1129_vm7, %v1127_v52, %v1128_v53  ;;  %vm1138_vm8 = vcmp.lt.s32.totalorder %v1136_v54, %v1137_v56 }
 0x324   : > { %vm1140_vm9 = vcmp.lt.s32.totalorder %v1130_v57, 7  ;;  %v1139_v59 = vsel %vm1138_vm8, %v1136_v54, %v1137_v56 }
 0x325   : > { %v1141_v44 = vsel %vm1140_vm9, %v1130_v57, 7  ;;  %vm1142_vm10 = vcmp.lt.s32.totalorder %v1139_v59, 7 }
 0x326   : > { %v1143_v61 = vsel %vm1142_vm10, %v1139_v59, 7 }
 0x327   : > { %v1144_v63 = vcombine.low %v1141_v44, %v1143_v61  ;;  %1176 = sbr.rel (!%p1912_p5) target bundleno = 842 (0x34a), region = 52 }
 0x329   : > { %v1151_v0 = vrot.slane %v1144_v63, %v1150_v60 }
 0x32b   : > { %v1158_v1 = vrot.slane %v1151_v0, %v1150_v60 }
 0x32d   : > { %1163 = vst.msk [vmem:[%s2170_s12] sm:$0x3] %vm1161_vm11, %v1158_v1 }
 0x32e   : > { %s2290_s19 = smov (!%p1179_p11, %s1178_s19), 2 }
 0x32f   : > { %s2178_s20 = sshll.u32 %s2290_s19, 7 }
 0x330   : > { %s1183_s21 = ssub.s32 256, %s2178_s20 }
 0x331   : > { %1184 = vsyncadd %s2277_s13, %s1183_s21  ;;  %p1346_p12 = scmp.ne.s32.totalorder %s2178_s20, 0  ;;  %s1356_s22 = sshll.u32 %s1895_s9, 8 }
 0x332   : > { %s2188_s17 = scalar_lea.hbm %s2275_s7, %s1356_s22  ;;  %s1190_s18 = sshll.u32 %s2165_s26, 4  ;;  %s1191_s18 = int_to_ptr.vmem [resolvable:$true] %s1190_s18 }
 0x333   : > { %s1729_s19 = scalar_lea.vmem %s1191_s18, %s2178_s20  ;;  %s1827_s21 = smov [#allocation2]  }
 0x334   : > { %p1730_p13 = scmp.ne.s32.totalorder %s1191_s18, %s1729_s19  ;;  %s1733_s13 = sshll.u32 %s1827_s21, 4  ;;  %s1734_s13 = int_to_ptr.vmem [resolvable:$false] %s1733_s13 }
 0x335   : > { %s1735_s0 = scalar_lea.vmem %s1734_s13, 512  ;;  %p1736_p2 = scmp.lt.s32.totalorder %s1191_s18, %s1734_s13 }
 0x336   : > { %p1731_p0 = pnand %p1730_p13, %p1346_p12  ;;  %p1737_p3 = scmp.lt.s32.totalorder %s1735_s0, %s1729_s19 }
 0x338   : > { %p1732_p1 = pneg %p1731_p0  ;;  %p1738_p4 = por %p1737_p3, %p1736_p2 }
 0x33a   : > { %p1739_p7 = pnand %p1738_p4, %p1732_p1 }
 0x33c   : > { %1742 = shalt.err (!%p1739_p7)
}
 0x33d   : > { %s1743_s26 = scalar_lea.hbm %s2188_s17, %s2178_s20  ;;  %s1747_s10 = scalar_lea.hbm %s2275_s7, 384 }
 0x33e   : > { %p1744_p8 = scmp.ne.s32.totalorder %s2188_s17, %s1743_s26  ;;  %p1748_p11 = scmp.lt.u32.totalorder %s2188_s17, %s2275_s7 }
 0x33f   : > { %p1749_p13 = scmp.lt.u32.totalorder %s1747_s10, %s1743_s26  ;;  %p1751_p1 = scmp.lt.u32.totalorder %s1743_s26, %s2188_s17 }
 0x340   : > { %p1745_p9 = pnand %p1744_p8, %p1346_p12 }
 0x341   : > { %p1750_p0 = por %p1749_p13, %p1748_p11 }
 0x342   : > { %p1746_p10 = pneg %p1745_p9 }
 0x343   : > { %p1752_p2 = por %p1751_p1, %p1750_p0 }
 0x345   : > { %p1753_p3 = pnand %p1752_p2, %p1746_p10 }
 0x347   : > { %1756 = shalt.err (!%p1753_p3)
}
 0x348   : > { %s2282_s19 = scalar_lea.sflag [#allocation3], %s2162_s24 }
 0x349   : > { %1193 = dma.vmem_to_hbm [thread:$0]  (%p1346_p12), %s1191_s18, %s2178_s20, %s2188_s17, %s2282_s19  }
 0x34a PF: > { %1196 = sbr.rel (!%p1912_p5) target bundleno = 877 (0x36d), region = 56  ;;  %s1350_s21 = sshll.u32 (%p1912_p5), %s1895_s9, 1 }
 0x34b   : > { %s1198_s22 = ssub.s32 (%p1912_p5), 3, %s1350_s21  ;;  %s2283_s10 = scalar_lea.sflag (%p1912_p5), [#allocation5], %s2162_s24 }
 0x34c   : > { %p1199_p4 = scmp.lt.s32.totalorder (%p1912_p5), %s1198_s22, 2 }
 0x351   : > { %s2292_s22 = smov (!%p1199_p4, %s1198_s22), 2 }
 0x352   : > { %s2216_s26 = sshll.u32 %s2292_s22, 4 }
 0x353   : > { %s1203_s25 = ssub.s32 32, %s2216_s26 }
 0x354   : > { %1204 = vsyncadd %s2283_s10, %s1203_s25  ;;  %p1352_p12 = scmp.ne.s32.totalorder %s2216_s26, 0  ;;  %s2226_s20 = scalar_lea.hbm %s2276_s8, %s1932_s23 }
 0x355   : > { %s1209_s9 = sshll.u32 %s2170_s12, 4  ;;  %s1828_s13 = smov [#allocation4]   ;;  %s1210_s9 = int_to_ptr.vmem [resolvable:$true] %s1209_s9 }
 0x356   : > { %s1757_s18 = scalar_lea.vmem %s1210_s9, %s2216_s26  ;;  %s1761_s0 = sshll.u32 %s1828_s13, 4  ;;  %s1762_s0 = int_to_ptr.vmem [resolvable:$false] %s1761_s0 }
 0x357   : > { %p1758_p5 = scmp.ne.s32.totalorder %s1210_s9, %s1757_s18  ;;  %s1763_s19 = scalar_lea.vmem %s1762_s0, 64 }
 0x358   : > { %p1764_p9 = scmp.lt.s32.totalorder %s1210_s9, %s1762_s0  ;;  %p1765_p10 = scmp.lt.s32.totalorder %s1763_s19, %s1757_s18 }
 0x359   : > { %p1759_p7 = pnand %p1758_p5, %p1352_p12 }
 0x35a   : > { %p1766_p11 = por %p1765_p10, %p1764_p9 }
 0x35b   : > { %p1760_p8 = pneg %p1759_p7 }
 0x35d   : > { %p1767_p13 = pnand %p1766_p11, %p1760_p8 }
 0x35f   : > { %1770 = shalt.err (!%p1767_p13)
}
 0x360   : > { %s1771_s23 = scalar_lea.hbm %s2226_s20, %s2216_s26  ;;  %s1775_s22 = scalar_lea.hbm %s2276_s8, 48 }
 0x361   : > { %p1772_p0 = scmp.ne.s32.totalorder %s2226_s20, %s1771_s23  ;;  %p1776_p3 = scmp.lt.u32.totalorder %s2226_s20, %s2276_s8 }
 0x362   : > { %p1777_p4 = scmp.lt.u32.totalorder %s1775_s22, %s1771_s23  ;;  %p1779_p7 = scmp.lt.u32.totalorder %s1771_s23, %s2226_s20 }
 0x363   : > { %p1773_p1 = pnand %p1772_p0, %p1352_p12 }
 0x364   : > { %p1778_p5 = por %p1777_p4, %p1776_p3 }
 0x365   : > { %p1774_p2 = pneg %p1773_p1 }
 0x366   : > { %p1780_p8 = por %p1779_p7, %p1778_p5 }
 0x368   : > { %p1781_p9 = pnand %p1780_p8, %p1774_p2 }
 0x36a   : > { %1784 = shalt.err (!%p1781_p9)
}
 0x36b   : > { %s2284_s15 = scalar_lea.sflag [#allocation5], %s2162_s24 }
 0x36c   : > { %1212 = dma.vmem_to_hbm [thread:$0]  (%p1352_p12), %s1210_s9, %s2216_s26, %s2226_s20, %s2284_s15  }
 0x36d PF: > { %p1693_p10 = scmp.ge.s32.totalorder %s1823_s30, 2  ;;  %s1221_s17 = sand.u32 1, %s1811_s27  }
 0x36e   : > { %s1222_s18 = scalar_lea.sflag [#allocation3], %s1221_s17 }
 0x36f   : > { %p1687_p11 = pnand %p1693_p10, %p1916_p6 }
 0x371   : > { %1802 = dma.done.wait (!%p1687_p11), %s1222_s18, 256  }
 0x372   : > { %1804 = vsyncadd (!%p1687_p11), %s1222_s18, 4294967040  ;;  %s1231_s13 = scalar_lea.sflag [#allocation5], %s1221_s17 }
 0x373   : > { %1806 = dma.done.wait (!%p1687_p11), %s1231_s13, 32  }
 0x374   : > { %1808 = vsyncadd (!%p1687_p11), %s1231_s13, 4294967264  ;;  %p22_p12 = scmp.ge.s32.totalorder %s1899_s11, 4   ;;  %s2285_s27 = smov %s1815_s28 }
 0x375   : > { %s2286_s28 = smov %s1819_s29  ;;  %s2287_s29 = smov %s1910_s14 }
 0x376   : > { %s2288_s30 = smov %s1899_s11  ;;  %24 = sbr.rel (!%p22_p12) target bundleno = 7 (0x7), region = 100 }
 0x37d   :  { %1236 = vsyncpa [#allocation3], 1 }
 0x37e   :  { %1238 = vsyncpa [#allocation3 + $0x1], 1 }
 0x37f   :  { %1239 = vsyncpa [#allocation5], 1 }
 0x380   :  { %1241 = vsyncpa [#allocation5 + $0x1], 1 }

</bundles_post_ra>
